<compile_context>
chip_gen: v5e
topology: v5e:2x2
jax: 0.10.0
libtpu: 0.0.40
codegen_flags: <defaults>
</compile_context>

<pallas_src>
import functools

import jax
import jax.numpy as jnp
from jax.experimental import pallas as pl
from jax.experimental.pallas import tpu as pltpu

_TILE_M = 1024       # batch tile: picked for DMA / per-step-overhead efficiency
                     # (sweep 512-2048), not MXU shape.  1024 x 40 f32 input
                     # tile = 160 KiB per step vs ~0.35 us step overhead.
_MIN_PALLAS_N = 256  # below this, plain fused jnp beats the pallas_call fixed
                     # cost (grid prologue, DMA setup, custom-call launch).


def _fused_mlp_kernel(x_ref, *refs, n_layers: int):
    """refs = (w_ref_0, ..., w_ref_{L-1}, o_ref).  Whole layer chain fused.

    Feature dims keep their true (narrow) widths; Mosaic pads K/N lanes inside
    vregs, which costs no HBM bytes.  bf16 MXU inputs, f32 accumulation; SiLU
    in f32 (v5e has no bf16 VPU/EUP).
    """
    w_refs = refs[:n_layers]
    o_ref = refs[n_layers]
    h = x_ref[...].astype(jnp.bfloat16)
    for idx in range(n_layers):
        acc = jnp.dot(h, w_refs[idx][...], preferred_element_type=jnp.float32)
        if idx != n_layers - 1:
            acc = jax.nn.silu(acc)          # between-layer activation only
            h = acc.astype(jnp.bfloat16)
        else:
            o_ref[...] = acc.astype(o_ref.dtype)


def _ref_chain(x, weights):
    """Pure-JAX fused chain with the same bf16-input / f32-acc math.

    Also used as the small-N fast path (a 8x40 @ 40x32 matmul is
    sub-microsecond; Pallas launch overhead would dominate)."""
    h = x
    for idx, w in enumerate(weights):
        h = jnp.dot(h.astype(jnp.bfloat16), w,
                    preferred_element_type=jnp.float32)
        if idx != len(weights) - 1:
            h = jax.nn.silu(h)
    return h.astype(x.dtype)


def fused_mlp_pallas(x: jax.Array, weights) -> jax.Array:
    """x: (N, in_dim), f32 or bf16.  weights: list of bf16 (in, out) arrays
    (== torch W.T).  Returns (N, out_dim) in x.dtype.

    No HBM-side padding of batch or feature dims: narrow last dims are legal
    as full-extent blocks, and Pallas masks the ragged last batch tile."""
    n, in_dim = x.shape
    out_dim = weights[-1].shape[1]
    n_layers = len(weights)

    if n < _MIN_PALLAS_N:
        return _ref_chain(x, weights)

    kernel = functools.partial(_fused_mlp_kernel, n_layers=n_layers)
    out_shape = jax.ShapeDtypeStruct((n, out_dim), x.dtype)

    if n <= _TILE_M:
        # Single full-array block: skip the grid entirely (no grid-loop
        # prologue); every operand is one VMEM-resident block.
        return pl.pallas_call(kernel, out_shape=out_shape)(x, *weights)

    # Batch-tiled + pipelined: x / out stream tile-by-tile (last dims are the
    # full 40 / 32 extents, so no lane padding is moved over HBM); the tiny
    # weights stay VMEM-resident via a constant index_map (DMA'd once).  The
    # last tile may be ragged: its store is masked by Pallas, and its
    # out-of-bounds input rows only feed row-independent math (never reduce
    # across batch in this kernel without re-adding explicit masking).
    num_tiles = pl.cdiv(n, _TILE_M)
    return pl.pallas_call(
        kernel,
        out_shape=out_shape,
        grid=(num_tiles,),
        in_specs=[
            # If xprof still shows exposed DMA latency after tile_m=1024, add
            # pipeline_mode=pl.Buffered(3) here rather than shrinking tiles.
            pl.BlockSpec((_TILE_M, in_dim), lambda i: (i, 0)),
        ] + [pl.BlockSpec(w.shape, lambda i: (0, 0)) for w in weights],
        out_specs=pl.BlockSpec((_TILE_M, out_dim), lambda i: (i, 0)),
        # "parallel" shards batch tiles across TensorCores on megacore parts
        # (no-op on single-TC v5e/v6e).
        # TODO(synk): on v7x, prefer pltpu.CORE_PARALLEL (or pl.core_map over a
        # 2-core tensorcore mesh) so both TCs issue DMAs on disjoint tiles of
        # this bandwidth-bound op.
        compiler_params=pltpu.CompilerParams(
            dimension_semantics=("parallel",)),
    )(x, *weights)


class MultiLayerPerceptronPallas:
    """JAX/Pallas re-implementation of the PyTorch MultiLayerPerceptron.

    mlp_nodes = [input_dim, output_dim]  ->  a single bias-free Linear layer;
    the whole (general) layer chain runs fused inside one pallas_call.

    Note: MXU weights are stored in bf16 (a permanent ~8-bit-mantissa
    quantization vs the PyTorch f32 module) with f32 accumulation; the f32
    originals are kept in `weights_f32` for reference/accuracy checks.
    """

    def __init__(self, input_dim: int, output_dim: int, key: jax.Array):
        mlp_nodes = [input_dim] + [output_dim]
        self.output_dim = output_dim
        self.weights_f32 = []   # f32, (in, out) == torch W.T (reference math)
        self.weights = []       # bf16 copies fed to the MXU (no lane padding)
        for in_dim, out_dim in zip(mlp_nodes, mlp_nodes[1:]):
            key, sub = jax.random.split(key)
            bound = 1.0 / (in_dim ** 0.5)   # torch.nn.Linear default init range
            w_torch = jax.random.uniform(
                sub, (out_dim, in_dim), minval=-bound, maxval=bound,
                dtype=jnp.float32)
            w = jnp.transpose(w_torch)                    # (in, out)
            self.weights_f32.append(w)
            self.weights.append(w.astype(jnp.bfloat16))

    def __call__(self, x: jax.Array) -> jax.Array:
        return fused_mlp_pallas(x, self.weights)


if __name__ == "__main__":
    # Synthetic irreps dims (see header): input_dim=40, output_dim=32.
    input_dim = 40
    output_dim = 32

    key = jax.random.PRNGKey(0)
    key, mkey = jax.random.split(key)
    mlp = MultiLayerPerceptronPallas(input_dim, output_dim, mkey)

    def ref_bf16(x):
        # Same bf16-input / f32-accumulation math as the kernel.
        return _ref_chain(x, mlp.weights)

    def ref_f32(x):
        h = x
        for idx, w in enumerate(mlp.weights_f32):
            h = h @ w
            if idx != len(mlp.weights_f32) - 1:
                h = jax.nn.silu(h)
        return h

    # batch=8    -> small-N fused-jnp fast path
    # batch=512  -> single-block Pallas path (no grid)
    # batch=2500 -> multi-tile pipelined Pallas path with a ragged last tile
    #               (2500 = 2 * 1024 + 452), exercising the masked-store tail.
    for batch in (8, 512, 2500):
        key, xkey = jax.random.split(key)
        x = jax.random.normal(xkey, (batch, input_dim), dtype=jnp.float32)
        out = jax.block_until_ready(mlp(x))
        assert out.shape == (batch, output_dim), (batch, out.shape)

        r16 = ref_bf16(x)
        assert jnp.allclose(out, r16, atol=1e-4, rtol=1e-4), (
            batch, float(jnp.max(jnp.abs(out - r16))))

        # Loose sanity check vs. the full-f32 PyTorch-equivalent math
        # (difference is dominated by the bf16 input/weight quantization).
        r32 = ref_f32(x)
        assert jnp.allclose(out, r32, atol=5e-2, rtol=5e-2), (
            batch, float(jnp.max(jnp.abs(out - r32))))

    print("KERNEL_OK")
</pallas_src>

<mosaic_0001>
module attributes {stable_mosaic.version = 11 : i64} {
  func.func @_fused_mlp_kernel(%arg0: memref<512x40xf32, #tpu.memory_space<vmem>>, %arg1: memref<40x32xbf16, #tpu.memory_space<vmem>>, %arg2: memref<512x32xf32, #tpu.memory_space<vmem>>) attributes {dimension_semantics = [], scalar_prefetch = 0 : i64, scratch_operands = 0 : i64, tpu.core_type = #tpu.core_type<tc>} {
    %c0 = arith.constant 0 : index
    %c0_0 = arith.constant 0 : index
    %0 = vector.load %arg0[%c0, %c0_0] : memref<512x40xf32, #tpu.memory_space<vmem>>, vector<512x40xf32>
    %1 = arith.truncf %0 : vector<512x40xf32> to vector<512x40xbf16>
    %c0_1 = arith.constant 0 : index
    %c0_2 = arith.constant 0 : index
    %2 = vector.load %arg1[%c0_1, %c0_2] : memref<40x32xbf16, #tpu.memory_space<vmem>>, vector<40x32xbf16>
    %cst = arith.constant dense<0.000000e+00> : vector<512x32xf32>
    %3 = tpu.matmul %1, %2, %cst {dimension_numbers = #tpu.dot_dimension_numbers<[1], [0], [0], [1], [0, 0, 1, 1], [], []>} : vector<512x40xbf16>, vector<40x32xbf16>, vector<512x32xf32> -> vector<512x32xf32>
    %c0_3 = arith.constant 0 : index
    %c0_4 = arith.constant 0 : index
    %4 = vector.load %arg2[%c0_3, %c0_4] : memref<512x32xf32, #tpu.memory_space<vmem>>, vector<512x32xf32>
    tpu.vector_store %arg2[%c0_3, %c0_4], %3 {strides = array<i32>} : memref<512x32xf32, #tpu.memory_space<vmem>>, vector<512x32xf32>,
    return
  }
}

</mosaic_0001>

<bundles_post_ra>
// kernel: tpu_custom_call.1
= control target key start
LH: loop header
LB: loop body
LE: loop exit
PB: predicated region body
PF: predicated region fallthrough
CT: control target
= control target key end

     0   :  { %vm225_vm0 = vcmask 1043456   ;;  %vm128_vm1 = vcmask 326656   ;;  %vm398_vm2 = vcmask 261120   ;;  %s1022_s1 = inlined_call_operand.vmem [shape: bf16[40,32], index: 1, kind: input, shape index: {}]   ;;  %s1023_s0 = inlined_call_operand.vmem [shape: f32[512,40], index: 0, kind: input, shape index: {}]   ;;  %s1024_s2 = inlined_call_operand.vmem [shape: f32[512,32], index: 2, kind: output, shape index: {}]  }
   0x1   :  { %v112_v0 = vld [vmem:[%s1022_s1 + $0x10] sm:$0xf]  ;;  %v508_v4 = vld [vmem:[%s1022_s1 + $0x8] sm:$0xff]  ;;  %v507_v5 = vld [vmem:[%s1022_s1] sm:$0xff] }
   0x2   :  { %v122_v1 = vunpack.c.l.b16 %v112_v0  ;;  %v12_v6 = vld [vmem:[%s1023_s0] sm:$0xff]  ;;  %v13_v7 = vld [vmem:[%s1023_s0 + $0x8] sm:$0xff]  ;;  %v14_v18 = vld [vmem:[%s1023_s0 + $0x10] sm:$0xff] }
   0x3   :  { %v28_v8 = vld [vmem:[%s1023_s0 + $0x80] sm:$0xff]  ;;  %v29_v9 = vld [vmem:[%s1023_s0 + $0x88] sm:$0xff]  ;;  %v76_v14 = vpack.c.bf16 %v13_v7, %v12_v6  ;;  %v15_v19 = vld [vmem:[%s1023_s0 + $0x18] sm:$0xff] }
   0x4   :  { %v125_v2 = vpack.c.b16 %v122_v1, %v122_v1  ;;  %v44_v10 = vld [vmem:[%s1023_s0 + $0x100] sm:$0xff]  ;;  %v45_v11 = vld [vmem:[%s1023_s0 + $0x108] sm:$0xff]  ;;  %v84_v15 = vpack.c.bf16 %v29_v9, %v28_v8  ;;  %v30_v20 = vld [vmem:[%s1023_s0 + $0x90] sm:$0xff]  ;;  %v77_v26 = vpack.c.bf16 %v15_v19, %v14_v18 }
   0x5   :  { %v60_v12 = vld [vmem:[%s1023_s0 + $0x180] sm:$0xff]  ;;  %v61_v13 = vld [vmem:[%s1023_s0 + $0x188] sm:$0xff]  ;;  %v92_v16 = vpack.c.bf16 %v45_v11, %v44_v10  ;;  %v31_v21 = vld [vmem:[%s1023_s0 + $0x98] sm:$0xff] }
   0x6   :  { %v227_v3 = vsel %vm225_vm0, %v125_v2, 0  ;;  %v100_v17 = vpack.c.bf16 %v61_v13, %v60_v12  ;;  %v46_v22 = vld [vmem:[%s1023_s0 + $0x110] sm:$0xff]  ;;  %v47_v23 = vld [vmem:[%s1023_s0 + $0x118] sm:$0xff]  ;;  %v85_v27 = vpack.c.bf16 %v31_v21, %v30_v20  ;;  %v16_v30 = vld [vmem:[%s1023_s0 + $0x20] sm:$0xff] }
   0x7   :  { %234 = vmatpush.bf16.msra.mxu0 %v227_v3  ;;  %509 = vmatpush.bf16.msra.mxu1 %v227_v3  ;;  %v62_v24 = vld [vmem:[%s1023_s0 + $0x190] sm:$0xff]  ;;  %v63_v25 = vld [vmem:[%s1023_s0 + $0x198] sm:$0xff]  ;;  %v93_v28 = vpack.c.bf16 %v47_v23, %v46_v22  ;;  %v17_v31 = vld [vmem:[%s1023_s0 + $0x28] sm:$0xff] }
   0x8   :  { %510 = vmatpush.bf16.msra.mxu2 %v227_v3  ;;  %511 = vmatpush.bf16.msra.mxu3 %v227_v3  ;;  %v101_v29 = vpack.c.bf16 %v63_v25, %v62_v24  ;;  %v32_v32 = vld [vmem:[%s1023_s0 + $0xa0] sm:$0xff]  ;;  %v33_v33 = vld [vmem:[%s1023_s0 + $0xa8] sm:$0xff]  ;;  %v78_v38 = vpack.c.bf16 %v17_v31, %v16_v30  ;;  %v18_v42 = vld [vmem:[%s1023_s0 + $0x30] sm:$0xff] }
   0x9   :  { %v48_v34 = vld [vmem:[%s1023_s0 + $0x120] sm:$0xff]  ;;  %v49_v35 = vld [vmem:[%s1023_s0 + $0x128] sm:$0xff]  ;;  %v86_v39 = vpack.c.bf16 %v33_v33, %v32_v32  ;;  %v19_v43 = vld [vmem:[%s1023_s0 + $0x38] sm:$0xff] }
   0xa   :  { %v64_v36 = vld [vmem:[%s1023_s0 + $0x1a0] sm:$0xff]  ;;  %v65_v37 = vld [vmem:[%s1023_s0 + $0x1a8] sm:$0xff]  ;;  %v94_v40 = vpack.c.bf16 %v49_v35, %v48_v34  ;;  %v34_v44 = vld [vmem:[%s1023_s0 + $0xb0] sm:$0xff]  ;;  %v79_v50 = vpack.c.bf16 %v19_v43, %v18_v42 }
   0xb   :  { %235 = vmatpush.bf16.msra.mxu0 %v508_v4  ;;  %512 = vmatpush.bf16.msra.mxu1 %v508_v4  ;;  %v102_v41 = vpack.c.bf16 %v65_v37, %v64_v36  ;;  %v35_v45 = vld [vmem:[%s1023_s0 + $0xb8] sm:$0xff]  ;;  %v50_v46 = vld [vmem:[%s1023_s0 + $0x130] sm:$0xff]  ;;  %v20_v54 = vld [vmem:[%s1023_s0 + $0x40] sm:$0xff] }
   0xc   :  { %513 = vmatpush.bf16.msra.mxu2 %v508_v4  ;;  %514 = vmatpush.bf16.msra.mxu3 %v508_v4  ;;  %v51_v47 = vld [vmem:[%s1023_s0 + $0x138] sm:$0xff]  ;;  %v66_v48 = vld [vmem:[%s1023_s0 + $0x1b0] sm:$0xff]  ;;  %v87_v51 = vpack.c.bf16 %v35_v45, %v34_v44  ;;  %v21_v55 = vld [vmem:[%s1023_s0 + $0x48] sm:$0xff] }
   0xd   :  { %v67_v49 = vld [vmem:[%s1023_s0 + $0x1b8] sm:$0xff]  ;;  %v95_v52 = vpack.c.bf16 %v51_v47, %v50_v46  ;;  %v36_v56 = vld [vmem:[%s1023_s0 + $0xc0] sm:$0xff]  ;;  %v37_v57 = vld [vmem:[%s1023_s0 + $0xc8] sm:$0xff]  ;;  %v80_v62 = vpack.c.bf16 %v21_v55, %v20_v54 }
   0xe   :  { %v103_v53 = vpack.c.bf16 %v67_v49, %v66_v48  ;;  %v52_v58 = vld [vmem:[%s1023_s0 + $0x140] sm:$0xff]  ;;  %v53_v59 = vld [vmem:[%s1023_s0 + $0x148] sm:$0xff]  ;;  %v88_v63 = vpack.c.bf16 %v37_v57, %v36_v56  ;;  %v22_v2 = vld [vmem:[%s1023_s0 + $0x50] sm:$0xff] }
   0xf   :  { %236 = vmatpush.bf16.msra.mxu0 %v507_v5  ;;  %515 = vmatpush.bf16.msra.mxu1 %v507_v5  ;;  %v68_v60 = vld [vmem:[%s1023_s0 + $0x1c0] sm:$0xff]  ;;  %v69_v61 = vld [vmem:[%s1023_s0 + $0x1c8] sm:$0xff]  ;;  %v96_v0 = vpack.c.bf16 %v53_v59, %v52_v58  ;;  %v23_v3 = vld [vmem:[%s1023_s0 + $0x58] sm:$0xff] }
  0x10   :  { %516 = vmatpush.bf16.msra.mxu2 %v507_v5  ;;  %517 = vmatpush.bf16.msra.mxu3 %v507_v5  ;;  %v104_v1 = vpack.c.bf16 %v69_v61, %v68_v60  ;;  %v38_v4 = vld [vmem:[%s1023_s0 + $0xd0] sm:$0xff]  ;;  %v39_v5 = vld [vmem:[%s1023_s0 + $0xd8] sm:$0xff]  ;;  %v81_v10 = vpack.c.bf16 %v23_v3, %v22_v2  ;;  %v56_v18 = vld [vmem:[%s1023_s0 + $0x160] sm:$0xff] }
  0x11   :  { %v54_v6 = vld [vmem:[%s1023_s0 + $0x150] sm:$0xff]  ;;  %v55_v7 = vld [vmem:[%s1023_s0 + $0x158] sm:$0xff]  ;;  %v89_v11 = vpack.c.bf16 %v39_v5, %v38_v4  ;;  %v57_v19 = vld [vmem:[%s1023_s0 + $0x168] sm:$0xff] }
  0x12   :  { %475 = vmatmul.msk.bf16.vlgmr.msra.gmra.mxu0 %vm128_vm1, %v76_v14  ;;  %483 = vmatmul.msk.bf16.vlgmr.msra.gmra.mxu1 %vm128_vm1, %v84_v15  ;;  %v70_v8 = vld [vmem:[%s1023_s0 + $0x1d0] sm:$0xff]  ;;  %v71_v9 = vld [vmem:[%s1023_s0 + $0x1d8] sm:$0xff]  ;;  %v97_v12 = vpack.c.bf16 %v55_v7, %v54_v6  ;;  %v24_v14 = vld [vmem:[%s1023_s0 + $0x60] sm:$0xff]  ;;  %v98_v24 = vpack.c.bf16 %v57_v19, %v56_v18 }
  0x13   :  { %491 = vmatmul.msk.bf16.vlgmr.msra.gmra.mxu2 %vm128_vm1, %v92_v16  ;;  %499 = vmatmul.msk.bf16.vlgmr.msra.gmra.mxu3 %vm128_vm1, %v100_v17  ;;  %v105_v13 = vpack.c.bf16 %v71_v9, %v70_v8  ;;  %v25_v15 = vld [vmem:[%s1023_s0 + $0x68] sm:$0xff]  ;;  %v40_v16 = vld [vmem:[%s1023_s0 + $0xe0] sm:$0xff]  ;;  %v58_v30 = vld [vmem:[%s1023_s0 + $0x170] sm:$0xff] }
  0x14   :  { %v41_v17 = vld [vmem:[%s1023_s0 + $0xe8] sm:$0xff]  ;;  %v72_v20 = vld [vmem:[%s1023_s0 + $0x1e0] sm:$0xff]  ;;  %v82_v22 = vpack.c.bf16 %v25_v15, %v24_v14  ;;  %v59_v31 = vld [vmem:[%s1023_s0 + $0x178] sm:$0xff] }
  0x15   :  { %v73_v21 = vld [vmem:[%s1023_s0 + $0x1e8] sm:$0xff]  ;;  %v90_v23 = vpack.c.bf16 %v41_v17, %v40_v16  ;;  %v74_v32 = vld [vmem:[%s1023_s0 + $0x1f0] sm:$0xff]  ;;  %v75_v33 = vld [vmem:[%s1023_s0 + $0x1f8] sm:$0xff]  ;;  %v99_v36 = vpack.c.bf16 %v59_v31, %v58_v30 }
  0x16   :  { %v106_v25 = vpack.c.bf16 %v73_v21, %v72_v20  ;;  %v107_v37 = vpack.c.bf16 %v75_v33, %v74_v32 }
  0x22   :  { %476 = vmatmul.msk.bf16.gmra.mxu0 %vm128_vm1, %v77_v26  ;;  %484 = vmatmul.msk.bf16.gmra.mxu1 %vm128_vm1, %v85_v27  ;;  %v26_v26 = vld [vmem:[%s1023_s0 + $0x70] sm:$0xff]  ;;  %v27_v27 = vld [vmem:[%s1023_s0 + $0x78] sm:$0xff] }
  0x23   :  { %492 = vmatmul.msk.bf16.gmra.mxu2 %vm128_vm1, %v93_v28  ;;  %500 = vmatmul.msk.bf16.gmra.mxu3 %vm128_vm1, %v101_v29  ;;  %v42_v28 = vld [vmem:[%s1023_s0 + $0xf0] sm:$0xff]  ;;  %v43_v29 = vld [vmem:[%s1023_s0 + $0xf8] sm:$0xff]  ;;  %v83_v34 = vpack.c.bf16 %v27_v27, %v26_v26 }
  0x24   :  { %v91_v35 = vpack.c.bf16 %v43_v29, %v42_v28 }
  0x32   :  { %477 = vmatmul.msk.bf16.gmra.mxu0 %vm128_vm1, %v78_v38  ;;  %485 = vmatmul.msk.bf16.gmra.mxu1 %vm128_vm1, %v86_v39 }
  0x33   :  { %493 = vmatmul.msk.bf16.gmra.mxu2 %vm128_vm1, %v94_v40  ;;  %501 = vmatmul.msk.bf16.gmra.mxu3 %vm128_vm1, %v102_v41 }
  0x42   :  { %478 = vmatmul.msk.bf16.gmra.mxu0 %vm128_vm1, %v79_v50  ;;  %486 = vmatmul.msk.bf16.gmra.mxu1 %vm128_vm1, %v87_v51 }
  0x43   :  { %494 = vmatmul.msk.bf16.gmra.mxu2 %vm128_vm1, %v95_v52  ;;  %502 = vmatmul.msk.bf16.gmra.mxu3 %vm128_vm1, %v103_v53 }
  0x52   :  { %479 = vmatmul.msk.bf16.gmra.mxu0 %vm128_vm1, %v80_v62  ;;  %487 = vmatmul.msk.bf16.gmra.mxu1 %vm128_vm1, %v88_v63 }
  0x53   :  { %495 = vmatmul.msk.bf16.gmra.mxu2 %vm128_vm1, %v96_v0  ;;  %503 = vmatmul.msk.bf16.gmra.mxu3 %vm128_vm1, %v104_v1 }
  0x62   :  { %480 = vmatmul.msk.bf16.gmra.mxu0 %vm128_vm1, %v81_v10  ;;  %488 = vmatmul.msk.bf16.gmra.mxu1 %vm128_vm1, %v89_v11 }
  0x63   :  { %496 = vmatmul.msk.bf16.gmra.mxu2 %vm128_vm1, %v97_v12  ;;  %504 = vmatmul.msk.bf16.gmra.mxu3 %vm128_vm1, %v105_v13 }
  0x72   :  { %481 = vmatmul.msk.bf16.gmra.mxu0 %vm128_vm1, %v82_v22  ;;  %489 = vmatmul.msk.bf16.gmra.mxu1 %vm128_vm1, %v90_v23 }
  0x73   :  { %497 = vmatmul.msk.bf16.gmra.mxu2 %vm128_vm1, %v98_v24  ;;  %505 = vmatmul.msk.bf16.gmra.mxu3 %vm128_vm1, %v106_v25 }
  0x82   :  { %482 = vmatmul.msk.bf16.gmra.mxu0 %vm128_vm1, %v83_v34  ;;  %490 = vmatmul.msk.bf16.gmra.mxu1 %vm128_vm1, %v91_v35 }
  0x83   :  { %498 = vmatmul.msk.bf16.gmra.mxu2 %vm128_vm1, %v99_v36  ;;  %506 = vmatmul.msk.bf16.gmra.mxu3 %vm128_vm1, %v107_v37 }
  0x8f   :  { %v238_v38 = vpop.f32.mrf.mxu0  ;;  %v278_v39 = vpop.f32.mrf.mxu1 }
  0x90   :  { %399 = vst.msk [vmem:[%s1024_s2] sm:$0xff] %vm398_vm2, %v238_v38 }
  0x91   :  { %415 = vst.msk [vmem:[%s1024_s2 + $0x80] sm:$0xff] %vm398_vm2, %v278_v39 }
  0x96   :  { %v318_v40 = vpop.f32.mrf.mxu2  ;;  %v358_v41 = vpop.f32.mrf.mxu3 }
  0x97   :  { %431 = vst.msk [vmem:[%s1024_s2 + $0x100] sm:$0xff] %vm398_vm2, %v318_v40  ;;  %v240_v42 = vpop.f32.mrf.mxu0  ;;  %v280_v43 = vpop.f32.mrf.mxu1 }
  0x98   :  { %447 = vst.msk [vmem:[%s1024_s2 + $0x180] sm:$0xff] %vm398_vm2, %v358_v41 }
  0x99   :  { %400 = vst.msk [vmem:[%s1024_s2 + $0x8] sm:$0xff] %vm398_vm2, %v240_v42 }
  0x9a   :  { %416 = vst.msk [vmem:[%s1024_s2 + $0x88] sm:$0xff] %vm398_vm2, %v280_v43 }
  0x9e   :  { %v320_v44 = vpop.f32.mrf.mxu2  ;;  %v360_v45 = vpop.f32.mrf.mxu3 }
  0x9f   :  { %432 = vst.msk [vmem:[%s1024_s2 + $0x108] sm:$0xff] %vm398_vm2, %v320_v44  ;;  %v243_v46 = vpop.f32.mrf.mxu0  ;;  %v283_v47 = vpop.f32.mrf.mxu1 }
  0xa0   :  { %448 = vst.msk [vmem:[%s1024_s2 + $0x188] sm:$0xff] %vm398_vm2, %v360_v45 }
  0xa1   :  { %401 = vst.msk [vmem:[%s1024_s2 + $0x10] sm:$0xff] %vm398_vm2, %v243_v46 }
  0xa2   :  { %417 = vst.msk [vmem:[%s1024_s2 + $0x90] sm:$0xff] %vm398_vm2, %v283_v47 }
  0xa6   :  { %v323_v48 = vpop.f32.mrf.mxu2  ;;  %v363_v49 = vpop.f32.mrf.mxu3 }
  0xa7   :  { %433 = vst.msk [vmem:[%s1024_s2 + $0x110] sm:$0xff] %vm398_vm2, %v323_v48  ;;  %v245_v50 = vpop.f32.mrf.mxu0  ;;  %v285_v51 = vpop.f32.mrf.mxu1 }
  0xa8   :  { %449 = vst.msk [vmem:[%s1024_s2 + $0x190] sm:$0xff] %vm398_vm2, %v363_v49 }
  0xa9   :  { %402 = vst.msk [vmem:[%s1024_s2 + $0x18] sm:$0xff] %vm398_vm2, %v245_v50 }
  0xaa   :  { %418 = vst.msk [vmem:[%s1024_s2 + $0x98] sm:$0xff] %vm398_vm2, %v285_v51 }
  0xae   :  { %v325_v52 = vpop.f32.mrf.mxu2  ;;  %v365_v53 = vpop.f32.mrf.mxu3 }
  0xaf   :  { %434 = vst.msk [vmem:[%s1024_s2 + $0x118] sm:$0xff] %vm398_vm2, %v325_v52  ;;  %v248_v54 = vpop.f32.mrf.mxu0  ;;  %v288_v55 = vpop.f32.mrf.mxu1 }
  0xb0   :  { %450 = vst.msk [vmem:[%s1024_s2 + $0x198] sm:$0xff] %vm398_vm2, %v365_v53 }
  0xb1   :  { %403 = vst.msk [vmem:[%s1024_s2 + $0x20] sm:$0xff] %vm398_vm2, %v248_v54 }
  0xb2   :  { %419 = vst.msk [vmem:[%s1024_s2 + $0xa0] sm:$0xff] %vm398_vm2, %v288_v55 }
  0xb6   :  { %v328_v56 = vpop.f32.mrf.mxu2  ;;  %v368_v57 = vpop.f32.mrf.mxu3 }
  0xb7   :  { %435 = vst.msk [vmem:[%s1024_s2 + $0x120] sm:$0xff] %vm398_vm2, %v328_v56  ;;  %v250_v58 = vpop.f32.mrf.mxu0  ;;  %v290_v59 = vpop.f32.mrf.mxu1 }
  0xb8   :  { %451 = vst.msk [vmem:[%s1024_s2 + $0x1a0] sm:$0xff] %vm398_vm2, %v368_v57 }
  0xb9   :  { %404 = vst.msk [vmem:[%s1024_s2 + $0x28] sm:$0xff] %vm398_vm2, %v250_v58 }
  0xba   :  { %420 = vst.msk [vmem:[%s1024_s2 + $0xa8] sm:$0xff] %vm398_vm2, %v290_v59 }
  0xbe   :  { %v330_v60 = vpop.f32.mrf.mxu2  ;;  %v370_v61 = vpop.f32.mrf.mxu3 }
  0xbf   :  { %436 = vst.msk [vmem:[%s1024_s2 + $0x128] sm:$0xff] %vm398_vm2, %v330_v60  ;;  %v253_v62 = vpop.f32.mrf.mxu0  ;;  %v293_v63 = vpop.f32.mrf.mxu1 }
  0xc0   :  { %452 = vst.msk [vmem:[%s1024_s2 + $0x1a8] sm:$0xff] %vm398_vm2, %v370_v61 }
  0xc1   :  { %405 = vst.msk [vmem:[%s1024_s2 + $0x30] sm:$0xff] %vm398_vm2, %v253_v62 }
  0xc2   :  { %421 = vst.msk [vmem:[%s1024_s2 + $0xb0] sm:$0xff] %vm398_vm2, %v293_v63 }
  0xc6   :  { %v333_v0 = vpop.f32.mrf.mxu2  ;;  %v373_v1 = vpop.f32.mrf.mxu3 }
  0xc7   :  { %437 = vst.msk [vmem:[%s1024_s2 + $0x130] sm:$0xff] %vm398_vm2, %v333_v0  ;;  %v255_v2 = vpop.f32.mrf.mxu0  ;;  %v295_v3 = vpop.f32.mrf.mxu1 }
  0xc8   :  { %453 = vst.msk [vmem:[%s1024_s2 + $0x1b0] sm:$0xff] %vm398_vm2, %v373_v1 }
  0xc9   :  { %406 = vst.msk [vmem:[%s1024_s2 + $0x38] sm:$0xff] %vm398_vm2, %v255_v2 }
  0xca   :  { %422 = vst.msk [vmem:[%s1024_s2 + $0xb8] sm:$0xff] %vm398_vm2, %v295_v3 }
  0xce   :  { %v335_v4 = vpop.f32.mrf.mxu2  ;;  %v375_v5 = vpop.f32.mrf.mxu3 }
  0xcf   :  { %438 = vst.msk [vmem:[%s1024_s2 + $0x138] sm:$0xff] %vm398_vm2, %v335_v4  ;;  %v258_v6 = vpop.f32.mrf.mxu0  ;;  %v298_v7 = vpop.f32.mrf.mxu1 }
  0xd0   :  { %454 = vst.msk [vmem:[%s1024_s2 + $0x1b8] sm:$0xff] %vm398_vm2, %v375_v5 }
  0xd1   :  { %407 = vst.msk [vmem:[%s1024_s2 + $0x40] sm:$0xff] %vm398_vm2, %v258_v6 }
  0xd2   :  { %423 = vst.msk [vmem:[%s1024_s2 + $0xc0] sm:$0xff] %vm398_vm2, %v298_v7 }
  0xd6   :  { %v338_v8 = vpop.f32.mrf.mxu2  ;;  %v378_v9 = vpop.f32.mrf.mxu3 }
  0xd7   :  { %439 = vst.msk [vmem:[%s1024_s2 + $0x140] sm:$0xff] %vm398_vm2, %v338_v8  ;;  %v260_v10 = vpop.f32.mrf.mxu0  ;;  %v300_v11 = vpop.f32.mrf.mxu1 }
  0xd8   :  { %455 = vst.msk [vmem:[%s1024_s2 + $0x1c0] sm:$0xff] %vm398_vm2, %v378_v9 }
  0xd9   :  { %408 = vst.msk [vmem:[%s1024_s2 + $0x48] sm:$0xff] %vm398_vm2, %v260_v10 }
  0xda   :  { %424 = vst.msk [vmem:[%s1024_s2 + $0xc8] sm:$0xff] %vm398_vm2, %v300_v11 }
  0xde   :  { %v340_v12 = vpop.f32.mrf.mxu2  ;;  %v380_v13 = vpop.f32.mrf.mxu3 }
  0xdf   :  { %440 = vst.msk [vmem:[%s1024_s2 + $0x148] sm:$0xff] %vm398_vm2, %v340_v12  ;;  %v263_v14 = vpop.f32.mrf.mxu0  ;;  %v303_v15 = vpop.f32.mrf.mxu1 }
  0xe0   :  { %456 = vst.msk [vmem:[%s1024_s2 + $0x1c8] sm:$0xff] %vm398_vm2, %v380_v13 }
  0xe1   :  { %409 = vst.msk [vmem:[%s1024_s2 + $0x50] sm:$0xff] %vm398_vm2, %v263_v14 }
  0xe2   :  { %425 = vst.msk [vmem:[%s1024_s2 + $0xd0] sm:$0xff] %vm398_vm2, %v303_v15 }
  0xe6   :  { %v343_v16 = vpop.f32.mrf.mxu2  ;;  %v383_v17 = vpop.f32.mrf.mxu3 }
  0xe7   :  { %441 = vst.msk [vmem:[%s1024_s2 + $0x150] sm:$0xff] %vm398_vm2, %v343_v16  ;;  %v265_v18 = vpop.f32.mrf.mxu0  ;;  %v305_v19 = vpop.f32.mrf.mxu1 }
  0xe8   :  { %457 = vst.msk [vmem:[%s1024_s2 + $0x1d0] sm:$0xff] %vm398_vm2, %v383_v17 }
  0xe9   :  { %410 = vst.msk [vmem:[%s1024_s2 + $0x58] sm:$0xff] %vm398_vm2, %v265_v18 }
  0xea   :  { %426 = vst.msk [vmem:[%s1024_s2 + $0xd8] sm:$0xff] %vm398_vm2, %v305_v19 }
  0xee   :  { %v345_v20 = vpop.f32.mrf.mxu2  ;;  %v385_v21 = vpop.f32.mrf.mxu3 }
  0xef   :  { %442 = vst.msk [vmem:[%s1024_s2 + $0x158] sm:$0xff] %vm398_vm2, %v345_v20  ;;  %v268_v22 = vpop.f32.mrf.mxu0  ;;  %v308_v23 = vpop.f32.mrf.mxu1 }
  0xf0   :  { %458 = vst.msk [vmem:[%s1024_s2 + $0x1d8] sm:$0xff] %vm398_vm2, %v385_v21 }
  0xf1   :  { %411 = vst.msk [vmem:[%s1024_s2 + $0x60] sm:$0xff] %vm398_vm2, %v268_v22 }
  0xf2   :  { %427 = vst.msk [vmem:[%s1024_s2 + $0xe0] sm:$0xff] %vm398_vm2, %v308_v23 }
  0xf6   :  { %v348_v24 = vpop.f32.mrf.mxu2  ;;  %v388_v25 = vpop.f32.mrf.mxu3 }
  0xf7   :  { %443 = vst.msk [vmem:[%s1024_s2 + $0x160] sm:$0xff] %vm398_vm2, %v348_v24  ;;  %v270_v26 = vpop.f32.mrf.mxu0  ;;  %v310_v27 = vpop.f32.mrf.mxu1 }
  0xf8   :  { %459 = vst.msk [vmem:[%s1024_s2 + $0x1e0] sm:$0xff] %vm398_vm2, %v388_v25 }
  0xf9   :  { %412 = vst.msk [vmem:[%s1024_s2 + $0x68] sm:$0xff] %vm398_vm2, %v270_v26 }
  0xfa   :  { %428 = vst.msk [vmem:[%s1024_s2 + $0xe8] sm:$0xff] %vm398_vm2, %v310_v27 }
  0xfe   :  { %v350_v28 = vpop.f32.mrf.mxu2  ;;  %v390_v29 = vpop.f32.mrf.mxu3 }
  0xff   :  { %444 = vst.msk [vmem:[%s1024_s2 + $0x168] sm:$0xff] %vm398_vm2, %v350_v28  ;;  %v273_v30 = vpop.f32.mrf.mxu0  ;;  %v313_v31 = vpop.f32.mrf.mxu1 }
 0x100   :  { %460 = vst.msk [vmem:[%s1024_s2 + $0x1e8] sm:$0xff] %vm398_vm2, %v390_v29 }
 0x101   :  { %413 = vst.msk [vmem:[%s1024_s2 + $0x70] sm:$0xff] %vm398_vm2, %v273_v30 }
 0x102   :  { %429 = vst.msk [vmem:[%s1024_s2 + $0xf0] sm:$0xff] %vm398_vm2, %v313_v31 }
 0x106   :  { %v353_v32 = vpop.f32.mrf.mxu2  ;;  %v393_v33 = vpop.f32.mrf.mxu3 }
 0x107   :  { %445 = vst.msk [vmem:[%s1024_s2 + $0x170] sm:$0xff] %vm398_vm2, %v353_v32  ;;  %v275_v34 = vpop.f32.mrf.mxu0  ;;  %v315_v35 = vpop.f32.mrf.mxu1 }
 0x108   :  { %461 = vst.msk [vmem:[%s1024_s2 + $0x1f0] sm:$0xff] %vm398_vm2, %v393_v33 }
 0x109   :  { %414 = vst.msk [vmem:[%s1024_s2 + $0x78] sm:$0xff] %vm398_vm2, %v275_v34 }
 0x10a   :  { %430 = vst.msk [vmem:[%s1024_s2 + $0xf8] sm:$0xff] %vm398_vm2, %v315_v35 }
 0x10e   :  { %v355_v36 = vpop.f32.mrf.mxu2  ;;  %v395_v37 = vpop.f32.mrf.mxu3 }
 0x10f   :  { %446 = vst.msk [vmem:[%s1024_s2 + $0x178] sm:$0xff] %vm398_vm2, %v355_v36 }
 0x110   :  { %462 = vst.msk [vmem:[%s1024_s2 + $0x1f8] sm:$0xff] %vm398_vm2, %v395_v37 }

</bundles_post_ra>
